<compile_context>
chip_gen: v7x
topology: tpu7x:2x2x1
jax: 0.10.0
libtpu: 0.0.40
codegen_flags: <defaults>
</compile_context>

<pallas_src>
import functools

import jax
import jax.numpy as jnp
from jax import lax
from jax.experimental import pallas as pl
from jax.experimental.pallas import tpu as pltpu


def _round_up(x, m):
    return (x + m - 1) // m * m


def _sepconv_kernel(x_ref, w_ref, o_ref, col_ref, *,
                    kh, kw, stride, cin_pad, wp, n_wide_pad, imgs):
    """Fused im2col + one MXU matmul for a block of `imgs` images.

    x_ref:   (imgs, Cin_pad, L_flat)     zero-padded images, H,W flattened row-major
    w_ref:   (Cout_pad, Kh*Kw*Cin_pad+8) fused depthwise*pointwise weights; the
                                         first column of the trailing 8-group
                                         carries the fused bias
    o_ref:   (imgs, Cout_pad, n_wide_pad)
    col_ref: (Kh*Kw*Cin_pad+8, imgs*n_wide_pad) im2col scratch (VMEM, persists)
    """
    kk = kh * kw

    # Bias rows: row 0 of the trailing 8-row group is 1, rest are 0.  Scratch
    # persists across grid steps, so write it only on the first step.
    @pl.when(pl.program_id(0) == 0)
    def _():
        ones_row = lax.broadcasted_iota(jnp.int32, (8, imgs * n_wide_pad), 0) == 0
        col_ref[kk * cin_pad:, :] = ones_row.astype(col_ref.dtype)

    # im2col: per image / per tap, one contiguous, lane-dense (multiple of 128),
    # 8-sublane aligned store straight from the input Ref (no relayouts).
    for b in range(imgs):
        lane0 = b * n_wide_pad
        for i in range(kh):
            for j in range(kw):
                t = i * kw + j
                base = i * wp + j
                if stride == 1:
                    sl = pl.ds(base, n_wide_pad)
                else:
                    # TODO(synk): compact decimated col / strided DMA for stride>1.
                    sl = pl.ds(base, n_wide_pad, stride)
                col_ref[t * cin_pad:(t + 1) * cin_pad,
                        lane0:lane0 + n_wide_pad] = x_ref[b, :, sl]

    # One MXU matmul, f32 accumulate; bias already folded into the contraction.
    y = jnp.dot(w_ref[...], col_ref[...], preferred_element_type=jnp.float32)
    for b in range(imgs):
        o_ref[b] = y[:, b * n_wide_pad:(b + 1) * n_wide_pad].astype(o_ref.dtype)


def separable_conv2d(x_nchw, dw_weight, dw_bias, pw_weight, pw_bias,
                     *, stride, padding):
    """Pallas SeparableConv2d (PyTorch semantics).

    x_nchw:    (N, Cin, H, W)
    dw_weight: (Cin, 1, K, K)     nn.Conv2d(groups=Cin) weight
    dw_bias:   (Cin,)
    pw_weight: (Cout, Cin, 1, 1)  nn.Conv2d 1x1 weight
    pw_bias:   (Cout,)
    returns:   (N, Cout, Ho, Wo)
    """
    n, cin, h, w = x_nchw.shape
    k = dw_weight.shape[-1]
    cout = pw_weight.shape[0]
    ho = (h + 2 * padding - k) // stride + 1
    wo = (w + 2 * padding - k) // stride + 1
    hp = h + 2 * padding
    wp = w + 2 * padding

    cin_pad = _round_up(cin, 8)          # 8 sublanes per tap group
    cout_pad = _round_up(cout, 8)
    n_wide = ho * wp                     # valid wide-row length (lane axis)
    n_wide_pad = _round_up(n_wide, 128)  # lane-dense stores
    kkc = k * k * cin_pad + 8            # contraction dim (+8 bias rows)

    # Extra bottom zero-rows so every tap's (padded / strided) slice is in-bounds.
    base_max = (k - 1) * wp + (k - 1)
    l_needed = base_max + stride * (n_wide_pad - 1) + 1
    extra = max(0, l_needed - hp * wp)
    extra_rows = -(-extra // wp)
    l_flat = (hp + extra_rows) * wp

    # ---- images per grid step from a conservative VMEM budget (v7x-safe).
    itemsize = jnp.dtype(x_nchw.dtype).itemsize
    per_img = (cin_pad * l_flat + kkc * n_wide_pad + cout_pad * n_wide_pad) * itemsize
    budget = 24 * 1024 * 1024
    imgs = int(max(1, min(n, budget // max(1, 2 * per_img))))
    n_pad = _round_up(n, imgs)
    num_blocks = n_pad // imgs

    # ---- glue: pad (batch, channels-to-8, zero halo) and flatten H,W.
    x_pad = jnp.pad(x_nchw, ((0, n_pad - n), (0, cin_pad - cin),
                             (padding, padding + extra_rows),
                             (padding, padding)))
    x_flat = x_pad.reshape(n_pad, cin_pad, l_flat)

    # ---- fold depthwise into pointwise (exact) and fold the bias in as well.
    dw = dw_weight[:, 0, :, :].astype(jnp.float32)            # (Cin, K, K)
    pw = pw_weight[:, :, 0, 0].astype(jnp.float32)            # (Cout, Cin)
    w_taps = jnp.einsum('oc,cij->oijc', pw, dw)               # (Cout, K, K, Cin)
    w_taps = jnp.pad(w_taps, ((0, cout_pad - cout), (0, 0), (0, 0),
                              (0, cin_pad - cin)))
    w_taps = w_taps.reshape(cout_pad, k * k * cin_pad)
    b_comb = pw_bias.astype(jnp.float32) + pw @ dw_bias.astype(jnp.float32)
    bias_cols = jnp.zeros((cout_pad, 8), jnp.float32).at[:cout, 0].set(b_comb)
    w_comb = jnp.concatenate([w_taps, bias_cols], axis=1).astype(x_nchw.dtype)

    kernel = functools.partial(_sepconv_kernel, kh=k, kw=k, stride=stride,
                               cin_pad=cin_pad, wp=wp, n_wide_pad=n_wide_pad,
                               imgs=imgs)

    # Explicit VMEM budget: 2x double-buffered input/output blocks + scratch.
    x_block = imgs * cin_pad * l_flat * itemsize
    out_block = imgs * cout_pad * n_wide_pad * itemsize
    w_bytes = cout_pad * kkc * itemsize
    col_bytes = kkc * imgs * n_wide_pad * itemsize
    vmem_limit = max(2 * (x_block + out_block + w_bytes) + col_bytes + (4 << 20),
                     16 * 1024 * 1024)

    cost = pl.CostEstimate(
        flops=2 * num_blocks * cout_pad * kkc * imgs * n_wide_pad,
        transcendentals=0,
        bytes_accessed=int(x_flat.size * itemsize + w_comb.size * itemsize
                           + n_pad * cout_pad * n_wide_pad * itemsize))

    out_wide = pl.pallas_call(
        kernel,
        out_shape=jax.ShapeDtypeStruct((n_pad, cout_pad, n_wide_pad), x_nchw.dtype),
        grid_spec=pltpu.PrefetchScalarGridSpec(
            num_scalar_prefetch=0,
            grid=(num_blocks,),
            in_specs=[
                pl.BlockSpec((imgs, cin_pad, l_flat), lambda g: (g, 0, 0)),
                pl.BlockSpec((cout_pad, kkc), lambda g: (0, 0)),
            ],
            out_specs=pl.BlockSpec((imgs, cout_pad, n_wide_pad),
                                   lambda g: (g, 0, 0)),
            scratch_shapes=[pltpu.VMEM((kkc, imgs * n_wide_pad), x_nchw.dtype)],
        ),
        compiler_params=pltpu.CompilerParams(
            dimension_semantics=("parallel",),
            vmem_limit_bytes=int(vmem_limit)),
        cost_estimate=cost,
    )(x_flat, w_comb)

    # Wide rows carry n_wide_pad lanes; only the first Ho*Wp are meaningful and
    # of each Wp-wide row only the first Wo columns are valid outputs.
    out = out_wide[:n, :cout, :ho * wp].reshape(n, cout, ho, wp)[:, :, :, :wo]
    return out


def _reference_nchw(x, dw_weight, dw_bias, pw_weight, pw_bias, *, stride, padding):
    """Pure-JAX NCHW reference matching PyTorch semantics (verification only)."""
    cin = x.shape[1]
    y = lax.conv_general_dilated(
        x, dw_weight, window_strides=(stride, stride),
        padding=((padding, padding), (padding, padding)),
        dimension_numbers=("NCHW", "OIHW", "NCHW"),
        feature_group_count=cin)
    y = y + dw_bias.reshape(1, -1, 1, 1)
    z = lax.conv_general_dilated(
        y, pw_weight, window_strides=(1, 1), padding=((0, 0), (0, 0)),
        dimension_numbers=("NCHW", "OIHW", "NCHW"))
    z = z + pw_bias.reshape(1, -1, 1, 1)
    return z


if __name__ == "__main__":
    # Small shapes consistent with the module: SeparableConv2d(4, 8, 3, 1, 1)
    N, CIN, H, W = 2, 4, 16, 16
    COUT, K, STRIDE, PAD = 8, 3, 1, 1

    key = jax.random.PRNGKey(0)
    kx, k1, k2, k3, k4 = jax.random.split(key, 5)
    x = jax.random.normal(kx, (N, CIN, H, W), dtype=jnp.float32)
    dw_weight = jax.random.normal(k1, (CIN, 1, K, K), dtype=jnp.float32) * 0.1
    dw_bias = jax.random.normal(k2, (CIN,), dtype=jnp.float32) * 0.1
    pw_weight = jax.random.normal(k3, (COUT, CIN, 1, 1), dtype=jnp.float32) * 0.1
    pw_bias = jax.random.normal(k4, (COUT,), dtype=jnp.float32) * 0.1

    out = separable_conv2d(x, dw_weight, dw_bias, pw_weight, pw_bias,
                           stride=STRIDE, padding=PAD)
    out = jax.block_until_ready(out)

    ref = _reference_nchw(x, dw_weight, dw_bias, pw_weight, pw_bias,
                          stride=STRIDE, padding=PAD)
    assert out.shape == (N, COUT, H, W), out.shape
    assert jnp.allclose(out, ref, atol=1e-4, rtol=1e-4), \
        float(jnp.max(jnp.abs(out - ref)))

    print("KERNEL_OK")
</pallas_src>

<mosaic_0001>
module attributes {stable_mosaic.version = 11 : i64} {
  func.func @_sepconv_kernel(%arg0: i32, %arg1: memref<2x8x432xf32, #tpu.memory_space<vmem>>, %arg2: memref<8x80xf32, #tpu.memory_space<vmem>>, %arg3: memref<2x8x384xf32, #tpu.memory_space<vmem>>, %arg4: memref<80x768xf32, #tpu.memory_space<vmem>>) attributes {dimension_semantics = [#tpu.dimension_semantics<parallel>], iteration_bounds = array<i64: 1>, scalar_prefetch = 0 : i64, scratch_operands = 1 : i64, tpu.core_type = #tpu.core_type<tc>, window_params = [{transform_indices = @transform_0, window_bounds = array<i64: 2, 8, 432>}, {pipeline_mode = #tpu.pipeline_mode<synchronous>, transform_indices = @transform_1, window_bounds = array<i64: 8, 80>}, {transform_indices = @transform_2, window_bounds = array<i64: 2, 8, 384>}]} {
    %c0_i32 = arith.constant 0 : i32
    %0 = arith.cmpi eq, %arg0, %c0_i32 : i32
    %1 = arith.extui %0 : i1 to i32
    %c0_i32_0 = arith.constant 0 : i32
    %2 = arith.cmpi ne, %1, %c0_i32_0 : i32
    scf.if %2 {
      %68 = tpu.iota {dimensions = array<i32: 0>} : vector<8x768xi32>
      %c0_i32_83 = arith.constant 0 : i32
      %69 = vector.broadcast %c0_i32_83 : i32 to vector<8x768xi32>
      %70 = arith.cmpi eq, %68, %69 : vector<8x768xi32>
      %71 = arith.extui %70 : vector<8x768xi1> to vector<8x768xi32>
      %72 = arith.sitofp %71 : vector<8x768xi32> to vector<8x768xf32>
      %c72 = arith.constant 72 : index
      %c0_84 = arith.constant 0 : index
      %73 = vector.load %arg4[%c72, %c0_84] : memref<80x768xf32, #tpu.memory_space<vmem>>, vector<8x768xf32>
      tpu.vector_store %arg4[%c72, %c0_84], %72 {strides = array<i32>} : memref<80x768xf32, #tpu.memory_space<vmem>>, vector<8x768xf32>,
    } else {
    }
    %c0 = arith.constant 0 : index
    %c0_1 = arith.constant 0 : index
    %c0_2 = arith.constant 0 : index
    %3 = vector.load %arg1[%c0, %c0_1, %c0_2] : memref<2x8x432xf32, #tpu.memory_space<vmem>>, vector<1x8x384xf32>
    %4 = vector.shape_cast %3 : vector<1x8x384xf32> to vector<8x384xf32>
    %c0_3 = arith.constant 0 : index
    %c0_4 = arith.constant 0 : index
    %5 = vector.load %arg4[%c0_3, %c0_4] : memref<80x768xf32, #tpu.memory_space<vmem>>, vector<8x384xf32>
    tpu.vector_store %arg4[%c0_3, %c0_4], %4 {strides = array<i32>} : memref<80x768xf32, #tpu.memory_space<vmem>>, vector<8x384xf32>,
    %c0_5 = arith.constant 0 : index
    %c0_6 = arith.constant 0 : index
    %c1 = arith.constant 1 : index
    %6 = vector.load %arg1[%c0_5, %c0_6, %c1] : memref<2x8x432xf32, #tpu.memory_space<vmem>>, vector<1x8x384xf32>
    %7 = vector.shape_cast %6 : vector<1x8x384xf32> to vector<8x384xf32>
    %c8 = arith.constant 8 : index
    %c0_7 = arith.constant 0 : index
    %8 = vector.load %arg4[%c8, %c0_7] : memref<80x768xf32, #tpu.memory_space<vmem>>, vector<8x384xf32>
    tpu.vector_store %arg4[%c8, %c0_7], %7 {strides = array<i32>} : memref<80x768xf32, #tpu.memory_space<vmem>>, vector<8x384xf32>,
    %c0_8 = arith.constant 0 : index
    %c0_9 = arith.constant 0 : index
    %c2 = arith.constant 2 : index
    %9 = vector.load %arg1[%c0_8, %c0_9, %c2] : memref<2x8x432xf32, #tpu.memory_space<vmem>>, vector<1x8x384xf32>
    %10 = vector.shape_cast %9 : vector<1x8x384xf32> to vector<8x384xf32>
    %c16 = arith.constant 16 : index
    %c0_10 = arith.constant 0 : index
    %11 = vector.load %arg4[%c16, %c0_10] : memref<80x768xf32, #tpu.memory_space<vmem>>, vector<8x384xf32>
    tpu.vector_store %arg4[%c16, %c0_10], %10 {strides = array<i32>} : memref<80x768xf32, #tpu.memory_space<vmem>>, vector<8x384xf32>,
    %c0_11 = arith.constant 0 : index
    %c0_12 = arith.constant 0 : index
    %c18 = arith.constant 18 : index
    %12 = vector.load %arg1[%c0_11, %c0_12, %c18] : memref<2x8x432xf32, #tpu.memory_space<vmem>>, vector<1x8x384xf32>
    %13 = vector.shape_cast %12 : vector<1x8x384xf32> to vector<8x384xf32>
    %c24 = arith.constant 24 : index
    %c0_13 = arith.constant 0 : index
    %14 = vector.load %arg4[%c24, %c0_13] : memref<80x768xf32, #tpu.memory_space<vmem>>, vector<8x384xf32>
    tpu.vector_store %arg4[%c24, %c0_13], %13 {strides = array<i32>} : memref<80x768xf32, #tpu.memory_space<vmem>>, vector<8x384xf32>,
    %c0_14 = arith.constant 0 : index
    %c0_15 = arith.constant 0 : index
    %c19 = arith.constant 19 : index
    %15 = vector.load %arg1[%c0_14, %c0_15, %c19] : memref<2x8x432xf32, #tpu.memory_space<vmem>>, vector<1x8x384xf32>
    %16 = vector.shape_cast %15 : vector<1x8x384xf32> to vector<8x384xf32>
    %c32 = arith.constant 32 : index
    %c0_16 = arith.constant 0 : index
    %17 = vector.load %arg4[%c32, %c0_16] : memref<80x768xf32, #tpu.memory_space<vmem>>, vector<8x384xf32>
    tpu.vector_store %arg4[%c32, %c0_16], %16 {strides = array<i32>} : memref<80x768xf32, #tpu.memory_space<vmem>>, vector<8x384xf32>,
    %c0_17 = arith.constant 0 : index
    %c0_18 = arith.constant 0 : index
    %c20 = arith.constant 20 : index
    %18 = vector.load %arg1[%c0_17, %c0_18, %c20] : memref<2x8x432xf32, #tpu.memory_space<vmem>>, vector<1x8x384xf32>
    %19 = vector.shape_cast %18 : vector<1x8x384xf32> to vector<8x384xf32>
    %c40 = arith.constant 40 : index
    %c0_19 = arith.constant 0 : index
    %20 = vector.load %arg4[%c40, %c0_19] : memref<80x768xf32, #tpu.memory_space<vmem>>, vector<8x384xf32>
    tpu.vector_store %arg4[%c40, %c0_19], %19 {strides = array<i32>} : memref<80x768xf32, #tpu.memory_space<vmem>>, vector<8x384xf32>,
    %c0_20 = arith.constant 0 : index
    %c0_21 = arith.constant 0 : index
    %c36 = arith.constant 36 : index
    %21 = vector.load %arg1[%c0_20, %c0_21, %c36] : memref<2x8x432xf32, #tpu.memory_space<vmem>>, vector<1x8x384xf32>
    %22 = vector.shape_cast %21 : vector<1x8x384xf32> to vector<8x384xf32>
    %c48 = arith.constant 48 : index
    %c0_22 = arith.constant 0 : index
    %23 = vector.load %arg4[%c48, %c0_22] : memref<80x768xf32, #tpu.memory_space<vmem>>, vector<8x384xf32>
    tpu.vector_store %arg4[%c48, %c0_22], %22 {strides = array<i32>} : memref<80x768xf32, #tpu.memory_space<vmem>>, vector<8x384xf32>,
    %c0_23 = arith.constant 0 : index
    %c0_24 = arith.constant 0 : index
    %c37 = arith.constant 37 : index
    %24 = vector.load %arg1[%c0_23, %c0_24, %c37] : memref<2x8x432xf32, #tpu.memory_space<vmem>>, vector<1x8x384xf32>
    %25 = vector.shape_cast %24 : vector<1x8x384xf32> to vector<8x384xf32>
    %c56 = arith.constant 56 : index
    %c0_25 = arith.constant 0 : index
    %26 = vector.load %arg4[%c56, %c0_25] : memref<80x768xf32, #tpu.memory_space<vmem>>, vector<8x384xf32>
    tpu.vector_store %arg4[%c56, %c0_25], %25 {strides = array<i32>} : memref<80x768xf32, #tpu.memory_space<vmem>>, vector<8x384xf32>,
    %c0_26 = arith.constant 0 : index
    %c0_27 = arith.constant 0 : index
    %c38 = arith.constant 38 : index
    %27 = vector.load %arg1[%c0_26, %c0_27, %c38] : memref<2x8x432xf32, #tpu.memory_space<vmem>>, vector<1x8x384xf32>
    %28 = vector.shape_cast %27 : vector<1x8x384xf32> to vector<8x384xf32>
    %c64 = arith.constant 64 : index
    %c0_28 = arith.constant 0 : index
    %29 = vector.load %arg4[%c64, %c0_28] : memref<80x768xf32, #tpu.memory_space<vmem>>, vector<8x384xf32>
    tpu.vector_store %arg4[%c64, %c0_28], %28 {strides = array<i32>} : memref<80x768xf32, #tpu.memory_space<vmem>>, vector<8x384xf32>,
    %c1_29 = arith.constant 1 : index
    %c0_30 = arith.constant 0 : index
    %c0_31 = arith.constant 0 : index
    %30 = vector.load %arg1[%c1_29, %c0_30, %c0_31] : memref<2x8x432xf32, #tpu.memory_space<vmem>>, vector<1x8x384xf32>
    %31 = vector.shape_cast %30 : vector<1x8x384xf32> to vector<8x384xf32>
    %c0_32 = arith.constant 0 : index
    %c384 = arith.constant 384 : index
    %32 = vector.load %arg4[%c0_32, %c384] : memref<80x768xf32, #tpu.memory_space<vmem>>, vector<8x384xf32>
    tpu.vector_store %arg4[%c0_32, %c384], %31 {strides = array<i32>} : memref<80x768xf32, #tpu.memory_space<vmem>>, vector<8x384xf32>,
    %c1_33 = arith.constant 1 : index
    %c0_34 = arith.constant 0 : index
    %c1_35 = arith.constant 1 : index
    %33 = vector.load %arg1[%c1_33, %c0_34, %c1_35] : memref<2x8x432xf32, #tpu.memory_space<vmem>>, vector<1x8x384xf32>
    %34 = vector.shape_cast %33 : vector<1x8x384xf32> to vector<8x384xf32>
    %c8_36 = arith.constant 8 : index
    %c384_37 = arith.constant 384 : index
    %35 = vector.load %arg4[%c8_36, %c384_37] : memref<80x768xf32, #tpu.memory_space<vmem>>, vector<8x384xf32>
    tpu.vector_store %arg4[%c8_36, %c384_37], %34 {strides = array<i32>} : memref<80x768xf32, #tpu.memory_space<vmem>>, vector<8x384xf32>,
    %c1_38 = arith.constant 1 : index
    %c0_39 = arith.constant 0 : index
    %c2_40 = arith.constant 2 : index
    %36 = vector.load %arg1[%c1_38, %c0_39, %c2_40] : memref<2x8x432xf32, #tpu.memory_space<vmem>>, vector<1x8x384xf32>
    %37 = vector.shape_cast %36 : vector<1x8x384xf32> to vector<8x384xf32>
    %c16_41 = arith.constant 16 : index
    %c384_42 = arith.constant 384 : index
    %38 = vector.load %arg4[%c16_41, %c384_42] : memref<80x768xf32, #tpu.memory_space<vmem>>, vector<8x384xf32>
    tpu.vector_store %arg4[%c16_41, %c384_42], %37 {strides = array<i32>} : memref<80x768xf32, #tpu.memory_space<vmem>>, vector<8x384xf32>,
    %c1_43 = arith.constant 1 : index
    %c0_44 = arith.constant 0 : index
    %c18_45 = arith.constant 18 : index
    %39 = vector.load %arg1[%c1_43, %c0_44, %c18_45] : memref<2x8x432xf32, #tpu.memory_space<vmem>>, vector<1x8x384xf32>
    %40 = vector.shape_cast %39 : vector<1x8x384xf32> to vector<8x384xf32>
    %c24_46 = arith.constant 24 : index
    %c384_47 = arith.constant 384 : index
    %41 = vector.load %arg4[%c24_46, %c384_47] : memref<80x768xf32, #tpu.memory_space<vmem>>, vector<8x384xf32>
    tpu.vector_store %arg4[%c24_46, %c384_47], %40 {strides = array<i32>} : memref<80x768xf32, #tpu.memory_space<vmem>>, vector<8x384xf32>,
    %c1_48 = arith.constant 1 : index
    %c0_49 = arith.constant 0 : index
    %c19_50 = arith.constant 19 : index
    %42 = vector.load %arg1[%c1_48, %c0_49, %c19_50] : memref<2x8x432xf32, #tpu.memory_space<vmem>>, vector<1x8x384xf32>
    %43 = vector.shape_cast %42 : vector<1x8x384xf32> to vector<8x384xf32>
    %c32_51 = arith.constant 32 : index
    %c384_52 = arith.constant 384 : index
    %44 = vector.load %arg4[%c32_51, %c384_52] : memref<80x768xf32, #tpu.memory_space<vmem>>, vector<8x384xf32>
    tpu.vector_store %arg4[%c32_51, %c384_52], %43 {strides = array<i32>} : memref<80x768xf32, #tpu.memory_space<vmem>>, vector<8x384xf32>,
    %c1_53 = arith.constant 1 : index
    %c0_54 = arith.constant 0 : index
    %c20_55 = arith.constant 20 : index
    %45 = vector.load %arg1[%c1_53, %c0_54, %c20_55] : memref<2x8x432xf32, #tpu.memory_space<vmem>>, vector<1x8x384xf32>
    %46 = vector.shape_cast %45 : vector<1x8x384xf32> to vector<8x384xf32>
    %c40_56 = arith.constant 40 : index
    %c384_57 = arith.constant 384 : index
    %47 = vector.load %arg4[%c40_56, %c384_57] : memref<80x768xf32, #tpu.memory_space<vmem>>, vector<8x384xf32>
    tpu.vector_store %arg4[%c40_56, %c384_57], %46 {strides = array<i32>} : memref<80x768xf32, #tpu.memory_space<vmem>>, vector<8x384xf32>,
    %c1_58 = arith.constant 1 : index
    %c0_59 = arith.constant 0 : index
    %c36_60 = arith.constant 36 : index
    %48 = vector.load %arg1[%c1_58, %c0_59, %c36_60] : memref<2x8x432xf32, #tpu.memory_space<vmem>>, vector<1x8x384xf32>
    %49 = vector.shape_cast %48 : vector<1x8x384xf32> to vector<8x384xf32>
    %c48_61 = arith.constant 48 : index
    %c384_62 = arith.constant 384 : index
    %50 = vector.load %arg4[%c48_61, %c384_62] : memref<80x768xf32, #tpu.memory_space<vmem>>, vector<8x384xf32>
    tpu.vector_store %arg4[%c48_61, %c384_62], %49 {strides = array<i32>} : memref<80x768xf32, #tpu.memory_space<vmem>>, vector<8x384xf32>,
    %c1_63 = arith.constant 1 : index
    %c0_64 = arith.constant 0 : index
    %c37_65 = arith.constant 37 : index
    %51 = vector.load %arg1[%c1_63, %c0_64, %c37_65] : memref<2x8x432xf32, #tpu.memory_space<vmem>>, vector<1x8x384xf32>
    %52 = vector.shape_cast %51 : vector<1x8x384xf32> to vector<8x384xf32>
    %c56_66 = arith.constant 56 : index
    %c384_67 = arith.constant 384 : index
    %53 = vector.load %arg4[%c56_66, %c384_67] : memref<80x768xf32, #tpu.memory_space<vmem>>, vector<8x384xf32>
    tpu.vector_store %arg4[%c56_66, %c384_67], %52 {strides = array<i32>} : memref<80x768xf32, #tpu.memory_space<vmem>>, vector<8x384xf32>,
    %c1_68 = arith.constant 1 : index
    %c0_69 = arith.constant 0 : index
    %c38_70 = arith.constant 38 : index
    %54 = vector.load %arg1[%c1_68, %c0_69, %c38_70] : memref<2x8x432xf32, #tpu.memory_space<vmem>>, vector<1x8x384xf32>
    %55 = vector.shape_cast %54 : vector<1x8x384xf32> to vector<8x384xf32>
    %c64_71 = arith.constant 64 : index
    %c384_72 = arith.constant 384 : index
    %56 = vector.load %arg4[%c64_71, %c384_72] : memref<80x768xf32, #tpu.memory_space<vmem>>, vector<8x384xf32>
    tpu.vector_store %arg4[%c64_71, %c384_72], %55 {strides = array<i32>} : memref<80x768xf32, #tpu.memory_space<vmem>>, vector<8x384xf32>,
    %c0_73 = arith.constant 0 : index
    %c0_74 = arith.constant 0 : index
    %57 = vector.load %arg2[%c0_73, %c0_74] : memref<8x80xf32, #tpu.memory_space<vmem>>, vector<8x80xf32>
    %c0_75 = arith.constant 0 : index
    %c0_76 = arith.constant 0 : index
    %58 = vector.load %arg4[%c0_75, %c0_76] : memref<80x768xf32, #tpu.memory_space<vmem>>, vector<80x768xf32>
    %cst = arith.constant dense<0.000000e+00> : vector<8x768xf32>
    %59 = tpu.matmul %57, %58, %cst {dimension_numbers = #tpu.dot_dimension_numbers<[1], [0], [0], [1], [0, 0, 1, 1], [], []>} : vector<8x80xf32>, vector<80x768xf32>, vector<8x768xf32> -> vector<8x768xf32>
    %60 = vector.extract_strided_slice %59 {offsets = [0, 0], sizes = [8, 384], strides = [1, 1]} : vector<8x768xf32> to vector<8x384xf32>
    %c0_77 = arith.constant 0 : index
    %c0_78 = arith.constant 0 : index
    %c0_79 = arith.constant 0 : index
    %61 = vector.load %arg3[%c0_77, %c0_78, %c0_79] : memref<2x8x384xf32, #tpu.memory_space<vmem>>, vector<1x8x384xf32>
    %62 = vector.shape_cast %61 : vector<1x8x384xf32> to vector<8x384xf32>
    %63 = vector.shape_cast %60 : vector<8x384xf32> to vector<1x8x384xf32>
    tpu.vector_store %arg3[%c0_77, %c0_78, %c0_79], %63 {strides = array<i32>} : memref<2x8x384xf32, #tpu.memory_space<vmem>>, vector<1x8x384xf32>,
    %64 = vector.extract_strided_slice %59 {offsets = [0, 384], sizes = [8, 384], strides = [1, 1]} : vector<8x768xf32> to vector<8x384xf32>
    %c1_80 = arith.constant 1 : index
    %c0_81 = arith.constant 0 : index
    %c0_82 = arith.constant 0 : index
    %65 = vector.load %arg3[%c1_80, %c0_81, %c0_82] : memref<2x8x384xf32, #tpu.memory_space<vmem>>, vector<1x8x384xf32>
    %66 = vector.shape_cast %65 : vector<1x8x384xf32> to vector<8x384xf32>
    %67 = vector.shape_cast %64 : vector<8x384xf32> to vector<1x8x384xf32>
    tpu.vector_store %arg3[%c1_80, %c0_81, %c0_82], %67 {strides = array<i32>} : memref<2x8x384xf32, #tpu.memory_space<vmem>>, vector<1x8x384xf32>,
    return
  }
  func.func @transform_0(%arg0: i32) -> (i32, i32, i32) {
    %c0_i32 = arith.constant 0 : i32
    %c0_i32_0 = arith.constant 0 : i32
    %c0_i32_1 = arith.constant 0 : i32
    return %arg0, %c0_i32, %c0_i32_0 : i32, i32, i32
  }
  func.func @transform_1(%arg0: i32) -> (i32, i32) {
    %c0_i32 = arith.constant 0 : i32
    %c0_i32_0 = arith.constant 0 : i32
    %c0_i32_1 = arith.constant 0 : i32
    return %c0_i32, %c0_i32_0 : i32, i32
  }
  func.func @transform_2(%arg0: i32) -> (i32, i32, i32) {
    %c0_i32 = arith.constant 0 : i32
    %c0_i32_0 = arith.constant 0 : i32
    %c0_i32_1 = arith.constant 0 : i32
    return %arg0, %c0_i32, %c0_i32_0 : i32, i32, i32
  }
}

</mosaic_0001>

<bundles_post_ra>
// kernel: tpu_custom_call.1
= control target key start
LH: loop header
LB: loop body
LE: loop exit
PB: predicated region body
PF: predicated region fallthrough
CT: control target
= control target key end

     0   :  { %7 = vsyncpa [#allocation4], 0  ;;  %s1381_s0 = inlined_call_operand.hbm [shape: f32[2,8,432], index: 0, kind: input, shape index: {}]   ;;  %s1382_s1 = inlined_call_operand.hbm [shape: f32[8,80], index: 1, kind: input, shape index: {}]   ;;  %s1383_s2 = inlined_call_operand.hbm [shape: f32[2,8,384], index: 2, kind: output, shape index: {}]  }
   0x1   :  { %8 = vsyncpa [#allocation7], 0 }
   0x2   :  { %9 = vsyncpa [#allocation5], 0  ;;  %s1093_s9 = smov [#allocation3]   ;;  %s1021_s13 = scalar_lea.hbm %s1381_s0, 1024 }
   0x3   :  { %s15_s10 = sshll.u32 %s1093_s9, 4  ;;  %p1022_p0 = scmp.ne.s32.totalorder %s1381_s0, %s1021_s13  ;;  %s16_s10 = int_to_ptr.vmem [resolvable:$true] %s15_s10 }
   0x4   :  { %p1025_p1 = scmp.lt.u32.totalorder %s1021_s13, %s1381_s0 }
   0x6   :  { %p1027_p2 = pnand %p1025_p1, %p1022_p0 }
   0x8   :  { %1030 = shalt.err (!%p1027_p2)
}
   0x9   :  { %s1031_s18 = scalar_lea.vmem %s16_s10, 1024  ;;  %p1036_p4 = scmp.lt.s32.totalorder %s16_s10, %s16_s10 }
   0xa   :  { %p1032_p3 = scmp.ne.s32.totalorder %s16_s10, %s1031_s18  ;;  %p1037_p5 = scmp.lt.s32.totalorder %s1031_s18, %s1031_s18 }
   0xc   :  { %p1038_p6 = por %p1037_p5, %p1036_p4 }
   0xe   :  { %p1039_p7 = pnand %p1038_p6, %p1032_p3 }
  0x10   :  { %1042 = shalt.err (!%p1039_p7)
}
  0x11   :  { %s1094_s19 = smov 512   ;;  %s1095_s20 = smov 32  }
  0x12   :  { %21 = dma.hbm_to_vmem [thread:$0]  %s1381_s0, 1024, %s16_s10, [#allocation4], %s1094_s19, %s1094_s19, %s1095_s20  }
  0x13   :  { %s1096_s23 = smov [#allocation6]   ;;  %s1043_s27 = scalar_lea.hbm %s1382_s1, 128 }
  0x14   :  { %s28_s24 = sshll.u32 %s1096_s23, 4  ;;  %p1044_p8 = scmp.ne.s32.totalorder %s1382_s1, %s1043_s27  ;;  %s29_s24 = int_to_ptr.vmem [resolvable:$true] %s28_s24 }
  0x15   :  { %p1047_p9 = scmp.lt.u32.totalorder %s1043_s27, %s1382_s1 }
  0x17   :  { %p1049_p10 = pnand %p1047_p9, %p1044_p8 }
  0x19   :  { %1052 = shalt.err (!%p1049_p10)
}
  0x1a   :  { %s1053_s4 = scalar_lea.vmem %s29_s24, 128  ;;  %p1058_p12 = scmp.lt.s32.totalorder %s29_s24, %s29_s24 }
  0x1b   :  { %p1054_p11 = scmp.ne.s32.totalorder %s29_s24, %s1053_s4  ;;  %p1059_p13 = scmp.lt.s32.totalorder %s1053_s4, %s1053_s4 }
  0x1d   :  { %p1060_p0 = por %p1059_p13, %p1058_p12 }
  0x1f   :  { %p1061_p1 = pnand %p1060_p0, %p1054_p11 }
  0x21   :  { %1064 = shalt.err (!%p1061_p1)
}
  0x22   :  { %31 = dma.hbm_to_vmem [thread:$0]  %s1382_s1, 128, %s29_s24, [#allocation7]  }
  0x23   :  { %1087 = dma.done.wait [#allocation4], 1024  }
  0x24   :  { %1088 = vsyncadd [#allocation4], 4294966272 }
  0x25   :  { %1089 = dma.done.wait [#allocation7], 128  }
  0x26   :  { %1090 = vsyncadd [#allocation7], 4294967168  ;;  %v1150_v0 = vld [vmem:[#allocation3 + $0x8] sm:$0xff]  ;;  %v1152_v1 = vld [vmem:[#allocation3 + $0x10] sm:$0xff]  ;;  %s1097_s6 = smov 126   ;;  %s1098_s7 = smov 127   ;;  %v42_v58 = vlaneseq }
  0x27   :  { %v1154_v2 = vld [vmem:[#allocation3] sm:$0xff]  ;;  %v881_v3 = vpack.i.bf16 %v1152_v1, %v1150_v0  ;;  %s1099_s1 = smov 110   ;;  %s1100_s8 = smov 108   ;;  %v62_v6 = vld [vmem:[#allocation3 + $0x18] sm:$0xff]  ;;  %v1173_v8 = vld [vmem:[#allocation3 + $0x28] sm:$0xff]  ;;  %v1104_v10 = vmov 0.0  }
  0x28   :  { %v1158_v4 = vld [vmem:[#allocation3 + $0x20] sm:$0xff]  ;;  %s1101_s9 = smov 109   ;;  %s1102_s10 = smov 91   ;;  %v277_v7 = vld [vmem:[#allocation3 + $0x38] sm:$0xff]  ;;  %v1175_v9 = vld [vmem:[#allocation3 + $0x30] sm:$0xff]  ;;  %603 = vmatprep.mubr.f32.mxu0 %v1104_v10  ;;  %674 = vmatprep.mubr.f32.mxu1 %v1104_v10  ;;  %vm75_vm0 = vcmask 1039360  }
  0x29   :  { %882 = vrot.lane.b32.xlu1 %v881_v3, %s1097_s6  ;;  %872 = vrot.lane.b32.xlu0 %v881_v3, %s1098_s7  ;;  %v876_v5 = vpack.i.bf16 %v1158_v4, %v1154_v2  ;;  %s1103_s11 = smov 92   ;;  %s1105_s12 = smov 90   ;;  %v946_v11 = vpack.i.bf16 %v62_v6, %v277_v7  ;;  %v941_v12 = vpack.i.bf16 %v1175_v9, %v1173_v8  ;;  %vm101_vm1 = vcmask 1031168  }
  0x2a   :  { %v1006_v13 = vpack.i.bf16 %v277_v7, %v1175_v9  ;;  %v1001_v14 = vpack.i.bf16 %v1173_v8, %v1158_v4  ;;  %vm127_vm2 = vcmask 900096   ;;  %vm153_vm3 = vcmask 891904   ;;  %s1108_s13 = smov [#allocation8]  }
  0x2b   :  { %vm179_vm4 = vcmask 883712   ;;  %vm231_vm5 = vcmask 744448   ;;  %vm205_vm6 = vcmask 752640   ;;  %vm257_vm7 = vcmask 736256   ;;  %s764_s14 = sshll.u32 %s1108_s13, 4  ;;  %s765_s14 = int_to_ptr.vmem [resolvable:$true] %s764_s14 }
  0x2c   :  { %vm1106_vm9 = vmmov 1   ;;  %vm535_vm11 = vcmask 654336   ;;  %s1065_s15 = scalar_lea.vmem %s765_s14, 768  ;;  %p1070_p3 = scmp.lt.s32.totalorder %s765_s14, %s765_s14 }
  0x2d   :  { %887 = vrot.lane.b32.xlu1 %v881_v3, %s1099_s1  ;;  %877 = vrot.lane.b32.xlu0 %v876_v5, %s1098_s7  ;;  %p1066_p2 = scmp.ne.s32.totalorder %s765_s14, %s1065_s15  ;;  %p1071_p4 = scmp.lt.s32.totalorder %s1065_s15, %s1065_s15 }
  0x2f   :  { %p1072_p5 = por %p1071_p4, %p1070_p3 }
  0x31   :  { %897 = vrot.lane.b32.xlu1 %v876_v5, %s1099_s1  ;;  %892 = vrot.lane.b32.xlu0 %v876_v5, %s1097_s6  ;;  %p1073_p6 = pnand %p1072_p5, %p1066_p2 }
  0x35   :  { %907 = vrot.lane.b32.xlu1 %v881_v3, %s1100_s8  ;;  %902 = vrot.lane.b32.xlu0 %v881_v3, %s1101_s9 }
  0x39   :  { %917 = vrot.lane.b32.xlu1 %v876_v5, %s1100_s8  ;;  %912 = vrot.lane.b32.xlu0 %v876_v5, %s1101_s9 }
  0x3d   :  { %927 = vrot.lane.b32.xlu1 %v881_v3, %s1102_s10  ;;  %922 = vrot.lane.b32.xlu0 %v881_v3, %s1103_s11 }
  0x41   :  { %223 = vrot.lane.b32.xlu1 %v1154_v2, %s1102_s10  ;;  %932 = vrot.lane.b32.xlu0 %v876_v5, %s1103_s11 }
  0x45   :  { %249 = vrot.lane.b32.xlu1 %v1154_v2, %s1105_s12  ;;  %937 = vrot.lane.b32.xlu0 %v881_v3, %s1105_s12 }
  0x49   :  { %947 = vrot.lane.b32.xlu1 %v946_v11, %s1098_s7  ;;  %942 = vrot.lane.b32.xlu0 %v941_v12, %s1098_s7 }
  0x4d   :  { %957 = vrot.lane.b32.xlu1 %v946_v11, %s1097_s6  ;;  %952 = vrot.lane.b32.xlu0 %v941_v12, %s1097_s6 }
  0x51   :  { %967 = vrot.lane.b32.xlu1 %v946_v11, %s1099_s1  ;;  %962 = vrot.lane.b32.xlu0 %v941_v12, %s1099_s1 }
  0x55   :  { %977 = vrot.lane.b32.xlu1 %v946_v11, %s1101_s9  ;;  %972 = vrot.lane.b32.xlu0 %v941_v12, %s1101_s9 }
  0x59   :  { %987 = vrot.lane.b32.xlu1 %v946_v11, %s1100_s8  ;;  %982 = vrot.lane.b32.xlu0 %v941_v12, %s1100_s8 }
  0x5d   :  { %997 = vrot.lane.b32.xlu1 %v946_v11, %s1103_s11  ;;  %992 = vrot.lane.b32.xlu0 %v941_v12, %s1103_s11 }
  0x61   :  { %1007 = vrot.lane.b32.xlu1 %v1006_v13, %s1102_s10  ;;  %1002 = vrot.lane.b32.xlu0 %v1001_v14, %s1102_s10 }
  0x65   :  { %1012 = vrot.lane.b32.xlu1 %v1001_v14, %s1105_s12  ;;  %229 = vrot.lane.b32.xlu0 %v62_v6, %s1102_s10 }
  0x69   :  { %255 = vrot.lane.b32.xlu1 %v62_v6, %s1105_s12  ;;  %1017 = vrot.lane.b32.xlu0 %v1006_v13, %s1105_s12  ;;  %v43_v6 = vshrl.u32 %v42_v58, 7 }
  0x6b   :  { %vm44_vm8 = vcmp.eq.s32.totalorder %v43_v6, 0 }
  0x6c   :  { %vm1280_vm10 = vmpackc.low %vm44_vm8, %vm1106_vm9 }
  0x9b   :  { %v1196_v15 = vpop.permute.xlu1 %882  ;;  %v1198_v16 = vpop.permute.xlu0 %872 }
  0x9c   :  { %v885_v17 = vunpack.i.h.bf16 %v1196_v15  ;;  %v884_v18 = vunpack.i.l.bf16 %v1196_v15  ;;  %v875_v19 = vunpack.i.h.bf16 %v1198_v16  ;;  %v874_v20 = vunpack.i.l.bf16 %v1198_v16 }
  0x9e   :  { %v77_v21 = vsel %vm75_vm0, %v874_v20, %v875_v19  ;;  %v103_v28 = vsel %vm101_vm1, %v884_v18, %v885_v17 }
  0x9f   :  { %v1207_v22 = vpop.permute.xlu1 %887  ;;  %v1209_v23 = vpop.permute.xlu0 %877  ;;  %v787_v24 = vpack.c.bf16 %v77_v21, %v1150_v0 }
  0xa0   :  { %v890_v25 = vunpack.i.h.bf16 %v1207_v22  ;;  %v889_v26 = vunpack.i.l.bf16 %v1207_v22  ;;  %v879_v27 = vunpack.i.l.bf16 %v1209_v23 }
  0xa1   :  { %788 = vmatprep.subr.bf16.mxu0 %v787_v24 }
  0xa2   :  { %v76_v29 = vsel %vm75_vm0, %v879_v27, %v874_v20  ;;  %v129_v30 = vsel %vm127_vm2, %v889_v26, %v890_v25 }
  0xa3   :  { %v1222_v31 = vpop.permute.xlu1 %897  ;;  %v1224_v32 = vpop.permute.xlu0 %892  ;;  %v789_v33 = vpack.c.bf16 %v76_v29, %v1154_v2  ;;  %v791_v34 = vpack.c.bf16 %v129_v30, %v103_v28  ;;  %v880_v28 = vunpack.i.h.bf16 %v1209_v23  ;;  %v1107_v29 = vmov 1.0  }
  0xa4   :  { %v899_v35 = vunpack.i.l.bf16 %v1222_v31  ;;  %v894_v36 = vunpack.i.l.bf16 %v1224_v32 }
  0xa5   :  { %790 = vmatpush1.bf16.msra.mxu0 %v789_v33 }
  0xa6   :  { %792 = vmatprep.subr.bf16.mxu0 %v791_v34  ;;  %v102_v37 = vsel %vm101_vm1, %v894_v36, %v884_v18  ;;  %v128_v38 = vsel %vm127_vm2, %v899_v35, %v889_v26 }
  0xa7   :  { %v1231_v39 = vpop.permute.xlu1 %907  ;;  %v1233_v40 = vpop.permute.xlu0 %902  ;;  %v793_v41 = vpack.c.bf16 %v128_v38, %v102_v37 }
  0xa8   :  { %v910_v42 = vunpack.i.h.bf16 %v1231_v39  ;;  %v909_v43 = vunpack.i.l.bf16 %v1231_v39  ;;  %v905_v44 = vunpack.i.h.bf16 %v1233_v40  ;;  %v904_v45 = vunpack.i.l.bf16 %v1233_v40 }
  0xa9   :  { %794 = vmatpush1.bf16.msra.mxu0 %v793_v41 }
  0xaa   :  { %v155_v46 = vsel %vm153_vm3, %v904_v45, %v905_v44  ;;  %v181_v47 = vsel %vm179_vm4, %v909_v43, %v910_v42 }
  0xab   :  { %v1245_v48 = vpop.permute.xlu1 %917  ;;  %v1247_v49 = vpop.permute.xlu0 %912  ;;  %v795_v50 = vpack.c.bf16 %v181_v47, %v155_v46 }
  0xac   :  { %v919_v51 = vunpack.i.l.bf16 %v1245_v48  ;;  %v914_v52 = vunpack.i.l.bf16 %v1247_v49  ;;  %v915_v22 = vunpack.i.h.bf16 %v1247_v49 }
  0xad   :  { %796 = vmatprep.subr.bf16.mxu0 %v795_v50 }
  0xae   :  { %v154_v53 = vsel %vm153_vm3, %v914_v52, %v904_v45  ;;  %v180_v54 = vsel %vm179_vm4, %v919_v51, %v909_v43 }
  0xaf   :  { %v1253_v55 = vpop.permute.xlu1 %927  ;;  %v1255_v56 = vpop.permute.xlu0 %922  ;;  %v797_v57 = vpack.c.bf16 %v180_v54, %v154_v53  ;;  %v1300_v54 = vld [vmem:[#allocation6] sm:$0xff] }
  0xb0   :  { %v930_v59 = vunpack.i.h.bf16 %v1253_v55  ;;  %v929_v60 = vunpack.i.l.bf16 %v1253_v55  ;;  %v925_v61 = vunpack.i.h.bf16 %v1255_v56  ;;  %v924_v62 = vunpack.i.l.bf16 %v1255_v56 }
  0xb1   :  { %798 = vmatpush1.bf16.msra.mxu0 %v797_v57 }
  0xb2   :  { %v207_v63 = vsel %vm205_vm6, %v924_v62, %v925_v61  ;;  %v233_v0 = vsel %vm231_vm5, %v929_v60, %v930_v59 }
  0xb3   :  { %v224_v2 = vpop.permute.xlu1 %223  ;;  %v1267_v3 = vpop.permute.xlu0 %932  ;;  %v799_v5 = vpack.c.bf16 %v233_v0, %v207_v63 }
  0xb4   :  { %v232_v7 = vsel %vm231_vm5, %v224_v2, %v929_v60  ;;  %v934_v11 = vunpack.i.l.bf16 %v1267_v3 }
  0xb5   :  { %800 = vmatprep.subr.bf16.mxu0 %v799_v5 }
  0xb6   :  { %v206_v12 = vsel %vm205_vm6, %v934_v11, %v924_v62 }
  0xb7   :  { %v250_v13 = vpop.permute.xlu1 %249  ;;  %v1272_v14 = vpop.permute.xlu0 %937  ;;  %v801_v18 = vpack.c.bf16 %v232_v7, %v206_v12 }
  0xb8   :  { %v940_v20 = vunpack.i.h.bf16 %v1272_v14  ;;  %v939_v21 = vunpack.i.l.bf16 %v1272_v14 }
  0xb9   :  { %802 = vmatpush1.bf16.msra.mxu0 %v801_v18 }
  0xba   :  { %v258_v24 = vsel %vm257_vm7, %v250_v13, %v939_v21  ;;  %v259_v26 = vsel %vm257_vm7, %v939_v21, %v940_v20 }
  0xbb   :  { %v803_v30 = vpack.c.bf16 %v1107_v29, %v259_v26  ;;  %v806_v33 = vpack.c.bf16 %v1107_v29, %v258_v24  ;;  %v948_v34 = vpop.permute.xlu1 %947  ;;  %v943_v35 = vpop.permute.xlu0 %942 }
  0xbc   :  { %v950_v36 = vunpack.i.h.bf16 %v948_v34  ;;  %v949_v37 = vunpack.i.l.bf16 %v948_v34  ;;  %v945_v38 = vunpack.i.h.bf16 %v943_v35  ;;  %v944_v41 = vunpack.i.l.bf16 %v943_v35 }
  0xbd   :  { %805 = vmatprep.subr.msk.bf16.mxu0 %vm1280_vm10, %v803_v30  ;;  %v920_v34 = vunpack.i.h.bf16 %v1245_v48 }
  0xbe   :  { %v291_v43 = vsel %vm75_vm0, %v944_v41, %v945_v38  ;;  %808 = vmatpush1.bf16.msk.msra.mxu0 %vm1280_vm10, %v806_v33  ;;  %v290_v23 = vsel %vm75_vm0, %v880_v28, %v944_v41  ;;  %v292_v45 = vsel %vm75_vm0, %v945_v38, %v949_v37  ;;  %v78_v46 = vsel %vm75_vm0, %v875_v19, %v950_v36 }
  0xbf   :  { %v833_v47 = vpack.c.bf16 %v291_v43, %v1173_v8  ;;  %v958_v50 = vpop.permute.xlu1 %957  ;;  %v953_v51 = vpop.permute.xlu0 %952  ;;  %v809_v52 = vpack.c.bf16 %v290_v23, %v1158_v4  ;;  %v831_v53 = vpack.c.bf16 %v292_v45, %v1175_v9  ;;  %v811_v57 = vpack.c.bf16 %v78_v46, %v1152_v1 }
  0xc0   :  { %v960_v58 = vunpack.i.h.bf16 %v958_v50  ;;  %v959_v60 = vunpack.i.l.bf16 %v958_v50  ;;  %v955_v62 = vunpack.i.h.bf16 %v953_v51  ;;  %v954_v63 = vunpack.i.l.bf16 %v953_v51 }
  0xc1   :  { %810 = vmatprep.subr.bf16.mxu1 %v809_v52  ;;  %832 = vmatprep.subr.bf16.mxu0 %v831_v53  ;;  %v900_v8 = vunpack.i.h.bf16 %v1222_v31  ;;  %v895_v4 = vunpack.i.h.bf16 %v1224_v32 }
  0xc2   :  { %778 = vmatmul.mubr.msk.f32.vlgmr.msra.gmra.mrb[0].mxu0 %vm535_vm11, %v1300_v54  ;;  %812 = vmatpush1.bf16.msra.mxu1 %v811_v57  ;;  %v316_v5 = vsel %vm101_vm1, %v954_v63, %v955_v62  ;;  %v317_v7 = vsel %vm101_vm1, %v955_v62, %v959_v60  ;;  %v104_v31 = vsel %vm101_vm1, %v885_v17, %v960_v58 }
  0xc3   :  { %834 = vmatpush1.bf16.msra.mxu0 %v833_v47  ;;  %v968_v9 = vpop.permute.xlu1 %967  ;;  %v963_v16 = vpop.permute.xlu0 %962  ;;  %745 = vmatprep.mubr.f32.mxu0 %v1104_v10  ;;  %v315_v6 = vsel %vm101_vm1, %v895_v4, %v954_v63  ;;  %v935_v63 = vunpack.i.h.bf16 %v1267_v3 }
  0xc4   :  { %v970_v1 = vunpack.i.h.bf16 %v968_v9  ;;  %v969_v19 = vunpack.i.l.bf16 %v968_v9  ;;  %v965_v0 = vunpack.i.h.bf16 %v963_v16  ;;  %v964_v2 = vunpack.i.l.bf16 %v963_v16 }
  0xc6   :  { %v341_v32 = vsel %vm127_vm2, %v964_v2, %v965_v0  ;;  %v340_v11 = vsel %vm127_vm2, %v900_v8, %v964_v2  ;;  %v342_v10 = vsel %vm127_vm2, %v965_v0, %v969_v19  ;;  %v130_v12 = vsel %vm127_vm2, %v890_v25, %v970_v1 }
  0xc7   :  { %v837_v13 = vpack.c.bf16 %v341_v32, %v316_v5  ;;  %v978_v18 = vpop.permute.xlu1 %977  ;;  %v973_v21 = vpop.permute.xlu0 %972  ;;  %v813_v24 = vpack.c.bf16 %v340_v11, %v315_v6  ;;  %v835_v26 = vpack.c.bf16 %v342_v10, %v317_v7  ;;  %v815_v28 = vpack.c.bf16 %v130_v12, %v104_v31 }
  0xc8   :  { %v980_v30 = vunpack.i.h.bf16 %v978_v18  ;;  %v979_v15 = vunpack.i.l.bf16 %v978_v18  ;;  %v975_v33 = vunpack.i.h.bf16 %v973_v21  ;;  %v974_v17 = vunpack.i.l.bf16 %v973_v21 }
  0xc9   :  { %814 = vmatprep.subr.bf16.mxu1 %v813_v24  ;;  %836 = vmatprep.subr.bf16.mxu0 %v835_v26 }
  0xca   :  { %816 = vmatpush1.bf16.msra.mxu1 %v815_v28  ;;  %838 = vmatpush1.bf16.msra.mxu0 %v837_v13  ;;  %v366_v43 = vsel %vm153_vm3, %v974_v17, %v975_v33  ;;  %v365_v23 = vsel %vm153_vm3, %v915_v22, %v974_v17  ;;  %v367_v45 = vsel %vm153_vm3, %v975_v33, %v979_v15 }
  0xcb   :  { %v988_v35 = vpop.permute.xlu1 %987  ;;  %v983_v25 = vpop.permute.xlu0 %982  ;;  %v156_v46 = vsel %vm153_vm3, %v905_v44, %v980_v30 }
  0xcc   :  { %v990_v36 = vunpack.i.h.bf16 %v988_v35  ;;  %v989_v37 = vunpack.i.l.bf16 %v988_v35  ;;  %v985_v38 = vunpack.i.h.bf16 %v983_v25  ;;  %v984_v41 = vunpack.i.l.bf16 %v983_v25 }
  0xce   :  { %v391_v48 = vsel %vm179_vm4, %v984_v41, %v985_v38  ;;  %v390_v49 = vsel %vm179_vm4, %v920_v34, %v984_v41  ;;  %v392_v47 = vsel %vm179_vm4, %v985_v38, %v989_v37  ;;  %v182_v50 = vsel %vm179_vm4, %v910_v42, %v990_v36 }
  0xcf   :  { %v841_v51 = vpack.c.bf16 %v391_v48, %v366_v43  ;;  %v998_v52 = vpop.permute.xlu1 %997  ;;  %v993_v53 = vpop.permute.xlu0 %992  ;;  %v817_v57 = vpack.c.bf16 %v390_v49, %v365_v23  ;;  %v839_v58 = vpack.c.bf16 %v392_v47, %v367_v45  ;;  %v819_v60 = vpack.c.bf16 %v182_v50, %v156_v46 }
  0xd0   :  { %v995_v62 = vunpack.i.h.bf16 %v993_v53  ;;  %v994_v40 = vunpack.i.l.bf16 %v993_v53  ;;  %v999_v44 = vunpack.i.l.bf16 %v998_v52  ;;  %v1000_v8 = vunpack.i.h.bf16 %v998_v52 }
  0xd1   :  { %818 = vmatprep.subr.bf16.mxu1 %v817_v57  ;;  %840 = vmatprep.subr.bf16.mxu0 %v839_v58 }
  0xd2   :  { %820 = vmatpush1.bf16.msra.mxu1 %v819_v60  ;;  %842 = vmatpush1.bf16.msra.mxu0 %v841_v51  ;;  %v416_v19 = vsel %vm205_vm6, %v994_v40, %v995_v62  ;;  %v415_v0 = vsel %vm205_vm6, %v935_v63, %v994_v40  ;;  %v417_v6 = vsel %vm205_vm6, %v995_v62, %v999_v44 }
  0xd3   :  { %v1008_v4 = vpop.permute.xlu1 %1007  ;;  %v1003_v39 = vpop.permute.xlu0 %1002  ;;  %v208_v18 = vsel %vm205_vm6, %v925_v61, %v1000_v8 }
  0xd4   :  { %v1010_v9 = vunpack.i.h.bf16 %v1008_v4  ;;  %v1009_v42 = vunpack.i.l.bf16 %v1008_v4  ;;  %v1005_v16 = vunpack.i.h.bf16 %v1003_v39  ;;  %v1004_v1 = vunpack.i.l.bf16 %v1003_v39 }
  0xd6   :  { %v441_v2 = vsel %vm231_vm5, %v1005_v16, %v1009_v42  ;;  %v440_v5 = vsel %vm231_vm5, %v1004_v1, %v1005_v16  ;;  %v442_v7 = vsel %vm231_vm5, %v1009_v42, %v1010_v9 }
  0xd7   :  { %v845_v3 = vpack.c.bf16 %v441_v2, %v416_v19  ;;  %v1013_v31 = vpop.permute.xlu1 %1012  ;;  %v230_v32 = vpop.permute.xlu0 %229  ;;  %v821_v11 = vpack.c.bf16 %v440_v5, %v415_v0  ;;  %v843_v10 = vpack.c.bf16 %v442_v7, %v417_v6 }
  0xd8   :  { %v1015_v12 = vunpack.i.h.bf16 %v1013_v31  ;;  %v1014_v13 = vunpack.i.l.bf16 %v1013_v31  ;;  %v234_v21 = vsel %vm231_vm5, %v930_v59, %v230_v32 }
  0xd9   :  { %v823_v24 = vpack.c.bf16 %v234_v21, %v208_v18  ;;  %822 = vmatprep.subr.bf16.mxu1 %v821_v11  ;;  %844 = vmatprep.subr.bf16.mxu0 %v843_v10 }
  0xda   :  { %v465_v26 = vsel %vm257_vm7, %v1014_v13, %v1015_v12  ;;  %846 = vmatpush1.bf16.msra.mxu0 %v845_v3 }
  0xdb   :  { %v825_v28 = vpack.c.bf16 %v1107_v29, %v465_v26  ;;  %v256_v30 = vpop.permute.xlu1 %255  ;;  %v1018_v15 = vpop.permute.xlu0 %1017  ;;  %824 = vmatpush1.bf16.msra.mxu1 %v823_v24 }
  0xdc   :  { %v260_v56 = vsel %vm257_vm7, %v940_v20, %v256_v30  ;;  %v1020_v61 = vunpack.i.h.bf16 %v1018_v15  ;;  %v1019_v33 = vunpack.i.l.bf16 %v1018_v15 }
  0xdd   :  { %v828_v55 = vpack.c.bf16 %v1107_v29, %v260_v56  ;;  %827 = vmatprep.subr.msk.bf16.mxu1 %vm1280_vm10, %v825_v28 }
  0xde   :  { %v466_v59 = vsel %vm257_vm7, %v1015_v12, %v1019_v33  ;;  %v467_v17 = vsel %vm257_vm7, %v1019_v33, %v1020_v61 }
  0xdf   :  { %v847_v34 = vpack.c.bf16 %v1107_v29, %v467_v17  ;;  %v850_v22 = vpack.c.bf16 %v1107_v29, %v466_v59  ;;  %830 = vmatpush1.bf16.msk.msra.mxu1 %vm1280_vm10, %v828_v55 }
  0xe1   :  { %849 = vmatprep.subr.msk.bf16.mxu0 %vm1280_vm10, %v847_v34 }
  0xe2   :  { %852 = vmatpush1.bf16.msk.msra.mxu0 %vm1280_vm10, %v850_v22  ;;  %779 = vmatmul.mubr.msk.f32.vlgmr.msra.gmra.mrb[0].mxu1 %vm535_vm11, %v1300_v54 }
  0xe5   :  { %780 = vmatmul.mubr.msk.f32.vlgmr.msra.gmra.mrb[2].mxu0 %vm535_vm11, %v1300_v54 }
 0x195   :  { %v605_v14 = vpop.f32.mrb[0].mxu0 }
 0x196   :  { %752 = vst [vmem:[#allocation8] sm:$0xff] %v605_v14  ;;  %v607_v20 = vpop.f32.mrb[1].mxu0 }
 0x197   :  { %753 = vst [vmem:[#allocation8 + $0x8] sm:$0xff] %v607_v20 }
 0x1b5   :  { %v676_v29 = vpop.f32.mrb[0].mxu1 }
 0x1b6   :  { %754 = vst [vmem:[#allocation8 + $0x10] sm:$0xff] %v676_v29  ;;  %v678_v35 = vpop.f32.mrb[1].mxu1 }
 0x1b7   :  { %756 = vst [vmem:[#allocation8 + $0x18] sm:$0xff] %v678_v35 }
 0x1b8   :  { %v747_v25 = vpop.f32.mrb[2].mxu0 }
 0x1b9   :  { %757 = vst [vmem:[#allocation8 + $0x20] sm:$0xff] %v747_v25  ;;  %v749_v27 = vpop.f32.mrb[3].mxu0 }
 0x1ba   :  { %758 = vst [vmem:[#allocation8 + $0x28] sm:$0xff] %v749_v27 }
 0x1bb   :  { %1076 = shalt.err (!%p1073_p6)
}
 0x1bc   :  { %s1077_s18 = scalar_lea.hbm %s1383_s2, 768 }
 0x1bd   :  { %p1078_p7 = scmp.ne.s32.totalorder %s1383_s2, %s1077_s18  ;;  %p1081_p8 = scmp.lt.u32.totalorder %s1077_s18, %s1383_s2 }
 0x1bf   :  { %p1083_p9 = pnand %p1081_p8, %p1078_p7 }
 0x1c1   :  { %1086 = shalt.err (!%p1083_p9)
}
 0x1c2   :  { %s1109_s23 = smov 384   ;;  %s1110_s24 = smov 24  }
 0x1c3   :  { %770 = dma.vmem_to_hbm [thread:$0]  %s765_s14, 768, %s1383_s2, [#allocation5], %s1109_s23, %s1109_s23, %s1110_s24  }
 0x1c4   :  { %1091 = dma.done.wait [#allocation5], 768  }
 0x1c5   :  { %1092 = vsyncadd [#allocation5], 4294966528 }
 0x1c6   :  { %774 = vsyncpa [#allocation4], 1 }
 0x1c7   :  { %775 = vsyncpa [#allocation7], 1 }
 0x1c8   :  { %776 = vsyncpa [#allocation5], 1 }

</bundles_post_ra>
